<compile_context>
chip_gen: v7x
topology: tpu7x:2x2x1
jax: 0.10.0
libtpu: 0.0.40
codegen_flags: <defaults>
</compile_context>

<pallas_src>
import functools

import jax
import jax.numpy as jnp
from jax.experimental import pallas as pl
from jax.experimental.pallas import tpu as pltpu

ALPHA = 0.25          # hard-coded in the PyTorch forward
_LANES = 128
_SUBLANES = 8


def _budgets():
    """(bytes per logits buffer, scoped-VMEM limit) chosen per TPU generation."""
    mib = 1024 * 1024
    vmem = 0
    try:
        info = pltpu.get_tpu_info()
        vmem = int(getattr(info, "vmem_capacity_bytes", 0) or 0)
    except Exception:           # query unavailable -> conservative defaults
        vmem = 0
    if vmem and vmem <= 64 * mib:        # v7x: 64 MiB VMEM per TensorCore
        return 4 * mib, 40 * mib
    if vmem >= 128 * mib:                # v5e / v6e: 128 MiB VMEM
        return 8 * mib, 64 * mib
    return 4 * mib, 32 * mib             # unknown backend: stay conservative


def _spatial_tile(S, C, N, tile_bytes, itemsize):
    """Largest lane-aligned spatial tile whose logits block fits tile_bytes."""
    s_ceil = pl.cdiv(S, _LANES) * _LANES
    ts = max(_LANES, (tile_bytes // (C * itemsize)) // _LANES * _LANES)
    ts = min(ts, s_ceil)
    # v7x megacore guard: with a single sample, keep >= 2 spatial grid steps.
    if N == 1 and ts >= s_ceil and S > _LANES:
        ts = pl.cdiv(pl.cdiv(S, 2), _LANES) * _LANES
    return ts


def _batch_fold(N, n_s, per_sample_bytes, tile_bytes):
    """Fold a batch factor into the block for small images (bigger DMAs),
    keeping at least 2 total grid steps for the v7x megacore when possible."""
    min_steps = min(2, N * n_s)
    for bn in range(N, 0, -1):
        if N % bn:
            continue
        if bn * per_sample_bytes > tile_bytes:
            continue
        if (N // bn) * n_s < min_steps:
            continue
        return bn
    return 1


def _focal_kernel(tgt_ref, logit_ref, out_ref, *, gamma, s_total, ts):
    # tgt_ref:   (BN, 1, TS)     int32  target class per pixel (assumed in [0, C))
    # logit_ref: (BN, C, TS)     float  logits for BN samples x one spatial tile
    # out_ref:   (1, 1, 8, 128)  f32    per-tile partial focal-loss sum
    s0 = pl.program_id(1) * ts
    x = logit_ref[...].astype(jnp.float32)                      # (BN, C, TS)
    t = tgt_ref[...]                                             # (BN, 1, TS)

    # Ragged last spatial tile: lanes past S read undefined HBM.  Sanitize the
    # logits BEFORE max/exp (0 * inf = NaN would poison the tile sum).
    lane = jax.lax.broadcasted_iota(jnp.int32, t.shape, 2)       # (BN, 1, TS)
    valid = (s0 + lane) < s_total                                # (BN, 1, TS)
    x = jnp.where(valid, x, 0.0)                                 # bcast over C

    cls = jax.lax.broadcasted_iota(jnp.int32, x.shape, 1)        # (BN, C, TS)
    sel = cls == t                                               # target one-hot

    m = jnp.max(x, axis=1, keepdims=True)                        # (BN, 1, TS)
    xm = x - m                                                   # (BN, C, TS)
    denom = jnp.sum(jnp.exp(xm), axis=1, keepdims=True)          # (BN, 1, TS)
    xm_t = jnp.sum(jnp.where(sel, xm, 0.0), axis=1, keepdims=True)

    nll = jnp.log(denom) - xm_t      # -log_softmax at target (the +m cancels)
    pt = jnp.exp(-nll)               # softmax prob of the target class
    # TODO(synk): -expm1(-nll) would be marginally more accurate as pt -> 1,
    # but the forward value difference is negligible; keep the simple exp.
    one_m_pt = jnp.maximum(1.0 - pt, 0.0)

    if float(gamma).is_integer():
        focus = one_m_pt ** int(gamma)        # lax.integer_pow: plain VPU muls
    else:
        focus = jnp.power(one_m_pt, jnp.float32(gamma))

    w = jnp.where(valid, (ALPHA * focus) * nll, 0.0)             # (BN, 1, TS)
    out_ref[...] = jnp.full(out_ref.shape, jnp.sum(w), dtype=jnp.float32)


def focal_loss(output, target, gamma=2.0):
    """output: (N, C, H, W) logits (f32 or bf16); target: (N, H, W) int class map.

    Targets are assumed to be valid class indices in [0, C) (same contract as
    the PyTorch gather); map any ignore labels before calling.
    """
    N, C, H, W = output.shape
    S = H * W
    itemsize = jnp.dtype(output.dtype).itemsize

    x = output.reshape(N, C, S)
    t = target.reshape(N, 1, S).astype(jnp.int32)

    tile_bytes, vmem_limit = _budgets()
    ts = _spatial_tile(S, C, N, tile_bytes, itemsize)
    n_s = pl.cdiv(S, ts)
    bn = _batch_fold(N, n_s, C * ts * itemsize, tile_bytes)
    nb = N // bn

    kernel = functools.partial(_focal_kernel, gamma=gamma, s_total=S, ts=ts)
    partials = pl.pallas_call(
        kernel,
        out_shape=jax.ShapeDtypeStruct((nb, n_s, _SUBLANES, _LANES), jnp.float32),
        grid_spec=pltpu.PrefetchScalarGridSpec(
            num_scalar_prefetch=0,
            grid=(nb, n_s),
            in_specs=[
                pl.BlockSpec((bn, 1, ts), lambda n, s: (n, 0, s)),
                pl.BlockSpec((bn, C, ts), lambda n, s: (n, 0, s)),
            ],
            out_specs=pl.BlockSpec((1, 1, _SUBLANES, _LANES),
                                   lambda n, s: (n, s, 0, 0)),
        ),
        compiler_params=pltpu.CompilerParams(
            dimension_semantics=("parallel", "parallel"),
            vmem_limit_bytes=vmem_limit),
    )(t, x)

    total = jnp.sum(partials[:, :, 0, 0])
    return total / (N * S)   # mean over the N*1*H*W gathered elements


def _reference(output, target, gamma=2.0):
    """Pure-JAX reference matching the PyTorch forward (for validation)."""
    _, C, _, _ = output.shape
    logp = jax.nn.log_softmax(output.astype(jnp.float32), axis=1)
    p = jnp.exp(logp)
    onehot = jax.nn.one_hot(target, C, axis=1, dtype=jnp.float32)   # (N,C,H,W)
    pt = jnp.sum(onehot * p, axis=1)
    nll = -jnp.sum(onehot * logp, axis=1)
    return jnp.mean(ALPHA * jnp.power(1.0 - pt, gamma) * nll)


if __name__ == "__main__":
    key = jax.random.PRNGKey(0)
    k_logits, k_tgt = jax.random.split(key)

    N, C, H, W = 2, 4, 16, 16
    gamma = 2.0                      # FocalLoss(y=2)
    output = jax.random.normal(k_logits, (N, C, H, W), dtype=jnp.float32)
    target = jax.random.randint(k_tgt, (N, H, W), 0, C, dtype=jnp.int32)

    loss = jax.jit(functools.partial(focal_loss, gamma=gamma))(output, target)
    loss = jax.block_until_ready(loss)

    ref = _reference(output, target, gamma)
    assert jnp.isfinite(loss), "non-finite loss"
    assert jnp.allclose(loss, ref, rtol=1e-4, atol=1e-5), (loss, ref)

    print("KERNEL_OK")
</pallas_src>

<mosaic_0001>
module attributes {stable_mosaic.version = 11 : i64} {
  func.func @_focal_kernel(%arg0: i32, %arg1: i32, %arg2: memref<1x1x256xi32, #tpu.memory_space<vmem>>, %arg3: memref<1x4x256xf32, #tpu.memory_space<vmem>>, %arg4: memref<1x1x8x128xf32, #tpu.memory_space<vmem>>) attributes {dimension_semantics = [#tpu.dimension_semantics<parallel>, #tpu.dimension_semantics<parallel>], iteration_bounds = array<i64: 2, 1>, scalar_prefetch = 0 : i64, scratch_operands = 0 : i64, tpu.core_type = #tpu.core_type<tc>, window_params = [{transform_indices = @transform_0, window_bounds = array<i64: 1, 1, 256>}, {transform_indices = @transform_1, window_bounds = array<i64: 1, 4, 256>}, {transform_indices = @transform_2, window_bounds = array<i64: 1, 1, 8, 128>}]} {
    %c256_i32 = arith.constant 256 : i32
    %0 = arith.muli %arg1, %c256_i32 : i32
    %c0 = arith.constant 0 : index
    %c0_0 = arith.constant 0 : index
    %c0_1 = arith.constant 0 : index
    %1 = vector.load %arg3[%c0, %c0_0, %c0_1] : memref<1x4x256xf32, #tpu.memory_space<vmem>>, vector<1x4x256xf32>
    %c0_2 = arith.constant 0 : index
    %c0_3 = arith.constant 0 : index
    %c0_4 = arith.constant 0 : index
    %2 = vector.load %arg2[%c0_2, %c0_3, %c0_4] : memref<1x1x256xi32, #tpu.memory_space<vmem>>, vector<1x1x256xi32>
    %3 = tpu.iota {dimensions = array<i32: 2>} : vector<1x1x256xi32>
    %4 = vector.broadcast %0 : i32 to vector<1x1x256xi32>
    %5 = arith.addi %4, %3 : vector<1x1x256xi32>
    %c256_i32_5 = arith.constant 256 : i32
    %6 = vector.broadcast %c256_i32_5 : i32 to vector<1x1x256xi32>
    %7 = arith.cmpi slt, %5, %6 : vector<1x1x256xi32>
    %cst = arith.constant 0.000000e+00 : f32
    %8 = vector.shape_cast %7 : vector<1x1x256xi1> to vector<1x1x256xi1>
    %9 = vector.broadcast %8 : vector<1x1x256xi1> to vector<1x4x256xi1>
    %10 = vector.broadcast %cst : f32 to vector<1x4x256xf32>
    %11 = arith.select %9, %1, %10 : vector<1x4x256xi1>, vector<1x4x256xf32>
    %12 = tpu.iota {dimensions = array<i32: 1>} : vector<1x4x256xi32>
    %13 = vector.broadcast %2 : vector<1x1x256xi32> to vector<1x4x256xi32>
    %14 = arith.cmpi eq, %12, %13 : vector<1x4x256xi32>
    %cst_6 = arith.constant dense<0xFF800000> : vector<1x256xf32>
    %15 = vector.multi_reduction <maximumf>, %11, %cst_6 [1] : vector<1x4x256xf32> to vector<1x256xf32>
    %16 = vector.shape_cast %15 : vector<1x256xf32> to vector<1x1x256xf32>
    %17 = vector.broadcast %16 : vector<1x1x256xf32> to vector<1x4x256xf32>
    %18 = arith.subf %11, %17 : vector<1x4x256xf32>
    %19 = math.exp %18 : vector<1x4x256xf32>
    %cst_7 = arith.constant dense<0.000000e+00> : vector<1x256xf32>
    %20 = vector.multi_reduction <add>, %19, %cst_7 [1] : vector<1x4x256xf32> to vector<1x256xf32>
    %21 = vector.shape_cast %20 : vector<1x256xf32> to vector<1x1x256xf32>
    %cst_8 = arith.constant 0.000000e+00 : f32
    %22 = vector.broadcast %cst_8 : f32 to vector<1x4x256xf32>
    %23 = arith.select %14, %18, %22 : vector<1x4x256xi1>, vector<1x4x256xf32>
    %cst_9 = arith.constant dense<0.000000e+00> : vector<1x256xf32>
    %24 = vector.multi_reduction <add>, %23, %cst_9 [1] : vector<1x4x256xf32> to vector<1x256xf32>
    %25 = vector.shape_cast %24 : vector<1x256xf32> to vector<1x1x256xf32>
    %26 = math.log %21 : vector<1x1x256xf32>
    %27 = arith.subf %26, %25 : vector<1x1x256xf32>
    %cst_10 = arith.constant 0.000000e+00 : f32
    %28 = vector.broadcast %cst_10 : f32 to vector<1x1x256xf32>
    %29 = arith.subf %28, %27 : vector<1x1x256xf32>
    %30 = math.exp %29 : vector<1x1x256xf32>
    %cst_11 = arith.constant 1.000000e+00 : f32
    %31 = vector.broadcast %cst_11 : f32 to vector<1x1x256xf32>
    %32 = arith.subf %31, %30 : vector<1x1x256xf32>
    %cst_12 = arith.constant 0.000000e+00 : f32
    %33 = vector.broadcast %cst_12 : f32 to vector<1x1x256xf32>
    %34 = arith.maximumf %32, %33 : vector<1x1x256xf32>
    %35 = arith.mulf %34, %34 : vector<1x1x256xf32>
    %cst_13 = arith.constant 2.500000e-01 : f32
    %36 = vector.broadcast %cst_13 : f32 to vector<1x1x256xf32>
    %37 = arith.mulf %36, %35 : vector<1x1x256xf32>
    %38 = arith.mulf %37, %27 : vector<1x1x256xf32>
    %cst_14 = arith.constant 0.000000e+00 : f32
    %39 = vector.broadcast %cst_14 : f32 to vector<1x1x256xf32>
    %40 = arith.select %7, %38, %39 : vector<1x1x256xi1>, vector<1x1x256xf32>
    %41 = vector.shape_cast %40 : vector<1x1x256xf32> to vector<1x1x1x256xf32>
    %cst_15 = arith.constant dense<0.000000e+00> : vector<1xf32>
    %42 = vector.multi_reduction <add>, %41, %cst_15 [1, 2, 3] : vector<1x1x1x256xf32> to vector<1xf32>
    %43 = vector.shape_cast %42 : vector<1xf32> to vector<1x1x1x1xf32>
    %44 = vector.extract %43[0, 0, 0, 0] : f32 from vector<1x1x1x1xf32>
    %45 = vector.broadcast %44 : f32 to vector<1x1x8x128xf32>
    %c0_16 = arith.constant 0 : index
    %c0_17 = arith.constant 0 : index
    %c0_18 = arith.constant 0 : index
    %c0_19 = arith.constant 0 : index
    %46 = vector.load %arg4[%c0_16, %c0_17, %c0_18, %c0_19] : memref<1x1x8x128xf32, #tpu.memory_space<vmem>>, vector<1x1x8x128xf32>
    tpu.vector_store %arg4[%c0_16, %c0_17, %c0_18, %c0_19], %45 {strides = array<i32>} : memref<1x1x8x128xf32, #tpu.memory_space<vmem>>, vector<1x1x8x128xf32>,
    return
  }
  func.func @transform_0(%arg0: i32, %arg1: i32) -> (i32, i32, i32) {
    %c0_i32 = arith.constant 0 : i32
    %c0_i32_0 = arith.constant 0 : i32
    return %arg0, %c0_i32, %arg1 : i32, i32, i32
  }
  func.func @transform_1(%arg0: i32, %arg1: i32) -> (i32, i32, i32) {
    %c0_i32 = arith.constant 0 : i32
    %c0_i32_0 = arith.constant 0 : i32
    return %arg0, %c0_i32, %arg1 : i32, i32, i32
  }
  func.func @transform_2(%arg0: i32, %arg1: i32) -> (i32, i32, i32, i32) {
    %c0_i32 = arith.constant 0 : i32
    %c0_i32_0 = arith.constant 0 : i32
    %c0_i32_1 = arith.constant 0 : i32
    return %arg0, %arg1, %c0_i32, %c0_i32_0 : i32, i32, i32, i32
  }
}

</mosaic_0001>

<bundles_post_ra>
// kernel: focal_loss.1
= control target key start
LH: loop header
LB: loop body
LE: loop exit
PB: predicated region body
PF: predicated region fallthrough
CT: control target
= control target key end

     0   :  { %s515_s9 = smov 0   ;;  %s517_s10 = smov 0   ;;  %s565_s0 = inlined_call_operand.vmem [shape: s32[2,1,256], index: 0, kind: input, shape index: {}]   ;;  %s566_s1 = inlined_call_operand.vmem [shape: f32[2,4,256], index: 1, kind: input, shape index: {}]   ;;  %s567_s2 = inlined_call_operand.vmem [shape: f32[2,1,8,128], index: 2, kind: output, shape index: {}]  }
   0x1   :  { %s519_s11 = smov 0  }
   0x2 LB: > { %s24_s12 = sadd.s32 1, %s494_s10  ;;  %p429_p0 = scmp.ge.s32.totalorder %s498_s11, 1  ;;  %s498_s11 = sphi %s519_s11, %s12_s11   ;;  %s494_s10 = sphi %s517_s10, %s569_s10   ;;  %s490_s9 = sphi %s515_s9, %s568_s9  }
   0x3   : > { %p26_p1 = scmp.ge.s32.totalorder %s24_s12, 2  ;;  %p149_p2 = scmp.lt.s32.totalorder %s498_s11, 3 }
   0x5   : > { %s571_s12 = smov (%p26_p1, %s24_s12), 0  ;;  %p150_p3 = pnand %p429_p0, %p149_p2 }
   0x6   : > { %p186_p4 = scmp.lt.s32.totalorder (!%p150_p3), %s490_s9, 1  ;;  %vm243_vm0 = vcmask (!%p150_p3), 1043456   ;;  %v231_v7 = vlaneseq (!%p150_p3)  ;;  %vm318_vm3 = vcmask (!%p150_p3), 1040384  }
   0x7   : > { %153 = sbr.rel (%p150_p3) target bundleno = 310 (0x136), region = 28 }
   0x8   : > { %v232_v12 = vshrl.u32 (!%p150_p3), %v231_v7, 7 }
   0xa   : > { %v235_v17 = vsub.s32 (!%p150_p3), 0, %v232_v12  ;;  %v239_v21 = vsub.s32 (!%p150_p3), 1, %v232_v12 }
   0xe   : > { %s573_s9 = smov (!%p186_p4, %s490_s9), 1 }
   0xf   : > { %s436_s13 = sshll.u32 %s573_s9, 3  ;;  %s430_s17 = sshll.u32 %s573_s9, 1 }
  0x10   : > { %s202_s16 = scalar_lea.vmem %s566_s1, %s436_s13  ;;  %s192_s20 = scalar_lea.vmem %s565_s0, %s430_s17 }
  0x11   : > { %v212_v0 = vld [vmem:[%s202_s16] sm:$0xff]  ;;  %s210_s23 = scalar_lea.vmem %s567_s2, %s436_s13 }
  0x12   : > { %v227_v1 = vcombine.high %v212_v0, %v212_v0  ;;  %v244_v2 = vsel %vm243_vm0, %v212_v0, -inf  ;;  %v213_v20 = vld [vmem:[%s192_s20] sm:$0x3] }
  0x13   : > { %v245_v3 = vrot.slane %v244_v2, 4  ;;  %v236_v24 = vrot.slane %v213_v20, %v235_v17  ;;  %v240_v26 = vrot.slane %v213_v20, %v239_v21 }
  0x14   : > { %v251_v4 = vsel %vm243_vm0, %v227_v1, -inf }
  0x15   : > { %v246_v5 = vmax.f32 %v244_v2, %v245_v3  ;;  %v252_v6 = vrot.slane %v251_v4, 4  ;;  %vm241_vm1 = vcmp.eq.s32.totalorder %v232_v12, %v236_v24  ;;  %vm242_vm2 = vcmp.eq.s32.totalorder %v232_v12, %v240_v26 }
  0x17   : > { %v247_v8 = vrot.slane %v246_v5, 2  ;;  %v253_v9 = vmax.f32 %v251_v4, %v252_v6 }
  0x19   : > { %v248_v10 = vmax.f32 %v246_v5, %v247_v8  ;;  %v254_v11 = vrot.slane %v253_v9, 2 }
  0x1b   : > { %v249_v13 = vrot.slane %v248_v10, 1  ;;  %v255_v14 = vmax.f32 %v253_v9, %v254_v11 }
  0x1d   : > { %v250_v15 = vmax.f32 %v248_v10, %v249_v13  ;;  %v256_v16 = vrot.slane %v255_v14, 1 }
  0x1f   : > { %v257_v18 = vmax.f32 %v255_v14, %v256_v16  ;;  %v258_v19 = vsub.f32 %v212_v0, %v250_v15 }
  0x21   : > { %v259_v22 = vsub.f32 %v227_v1, %v257_v18  ;;  %v260_v23 = vmul.f32 1.442695, %v258_v19  ;;  %v278_v27 = vsel %vm241_vm1, %v258_v19, 0.0 }
  0x22   : > { %v280_v30 = vsel %vm243_vm0, %v278_v27, 0.0 }
  0x23   : > { %464 = vpow2.f32 %v260_v23  ;;  %v262_v25 = vmul.f32 1.442695, %v259_v22  ;;  %v279_v28 = vsel %vm242_vm2, %v259_v22, 0.0  ;;  %v281_v36 = vrot.slane %v280_v30, 4 }
  0x24   : > { %v287_v34 = vsel %vm243_vm0, %v279_v28, 0.0 }
  0x25   : > { %466 = vpow2.f32 %v262_v25  ;;  %v288_v39 = vrot.slane %v287_v34, 4  ;;  %v282_v42 = vadd.f32 %v281_v36, %v280_v30 }
  0x27   : > { %v289_v45 = vadd.f32 %v288_v39, %v287_v34  ;;  %v283_v48 = vrot.slane %v282_v42, 2 }
  0x29   : > { %v290_v51 = vrot.slane %v289_v45, 2  ;;  %v284_v53 = vadd.f32 %v283_v48, %v282_v42 }
  0x2b   : > { %v291_v54 = vadd.f32 %v290_v51, %v289_v45  ;;  %v285_v55 = vrot.slane %v284_v53, 1 }
  0x2d   : > { %v465_v29 = vpop.eup %464  ;;  %v292_v56 = vrot.slane %v291_v54, 1  ;;  %v286_v57 = vadd.f32 %v285_v55, %v284_v53 }
  0x2e   : > { %v264_v31 = vsel %vm243_vm0, %v465_v29, 0.0 }
  0x2f   : > { %v467_v32 = vpop.eup %466  ;;  %v265_v33 = vrot.slane %v264_v31, 4  ;;  %v293_v59 = vadd.f32 %v292_v56, %v291_v54 }
  0x30   : > { %v271_v35 = vsel %vm243_vm0, %v467_v32, 0.0 }
  0x31   : > { %v266_v37 = vadd.f32 %v265_v33, %v264_v31  ;;  %v272_v38 = vrot.slane %v271_v35, 4 }
  0x33   : > { %v267_v40 = vrot.slane %v266_v37, 2  ;;  %v273_v41 = vadd.f32 %v272_v38, %v271_v35 }
  0x35   : > { %v268_v43 = vadd.f32 %v267_v40, %v266_v37  ;;  %v274_v44 = vrot.slane %v273_v41, 2 }
  0x37   : > { %v269_v46 = vrot.slane %v268_v43, 1  ;;  %v275_v47 = vadd.f32 %v274_v44, %v273_v41 }
  0x39   : > { %v270_v49 = vadd.f32 %v269_v46, %v268_v43  ;;  %v276_v50 = vrot.slane %v275_v47, 1 }
  0x3b   : > { %v277_v52 = vadd.f32 %v276_v50, %v275_v47  ;;  %468 = vlog2.f32 %v270_v49 }
  0x3d   : > { %470 = vlog2.f32 %v277_v52 }
  0x45   : > { %v469_v58 = vpop.eup %468 }
  0x46   : > { %v295_v60 = vmul.f32 0.6931472, %v469_v58 }
  0x47   : > { %v471_v61 = vpop.eup %470 }
  0x48   : > { %v297_v62 = vmul.f32 0.6931472, %v471_v61  ;;  %v298_v63 = vsub.f32 %v295_v60, %v286_v57 }
  0x4a   : > { %v299_v0 = vsub.f32 %v297_v62, %v293_v59  ;;  %v300_v1 = vsub.f32 0.0, %v298_v63 }
  0x4c   : > { %v301_v2 = vsub.f32 0.0, %v299_v0  ;;  %v302_v3 = vmul.f32 1.442695, %v300_v1 }
  0x4e   : > { %472 = vpow2.f32 %v302_v3  ;;  %v304_v4 = vmul.f32 1.442695, %v301_v2 }
  0x50   : > { %474 = vpow2.f32 %v304_v4 }
  0x58   : > { %v473_v5 = vpop.eup %472 }
  0x59   : > { %v306_v6 = vsub.f32 1.0, %v473_v5 }
  0x5a   : > { %v475_v7 = vpop.eup %474 }
  0x5b   : > { %v307_v8 = vsub.f32 1.0, %v475_v7  ;;  %v308_v9 = vmax.f32 %v306_v6, 0.0 }
  0x5d   : > { %v309_v10 = vmax.f32 %v307_v8, 0.0  ;;  %v310_v11 = vmul.f32 %v308_v9, %v308_v9 }
  0x5f   : > { %v311_v12 = vmul.f32 %v309_v10, %v309_v10  ;;  %v312_v13 = vmul.f32 0.25, %v310_v11 }
  0x61   : > { %v313_v14 = vmul.f32 0.25, %v311_v12  ;;  %v314_v15 = vmul.f32 %v312_v13, %v298_v63 }
  0x63   : > { %v315_v16 = vmul.f32 %v313_v14, %v299_v0  ;;  %v319_v17 = vsel %vm318_vm3, %v314_v15, 0.0 }
  0x65   : > { %v320_v18 = vsel %vm318_vm3, %v315_v16, 0.0 }
  0x66   : > { %v321_v19 = vadd.f32 %v320_v18, %v319_v17 }
  0x68   : > { %322 = vadd.xlane.f32.xlu0 %v321_v19 }
  0xf5   : > { %v323_v20 = vpop.xlane.xlu0 %322 }
  0xf6   : > { %v324_v21 = vrot.slane %v323_v20, 4 }
  0xf8   : > { %v325_v22 = vadd.f32 %v324_v21, %v323_v20 }
  0xfa   : > { %v326_v23 = vrot.slane %v325_v22, 2 }
  0xfc   : > { %v327_v24 = vadd.f32 %v326_v23, %v325_v22 }
  0xfe   : > { %v328_v25 = vrot.slane %v327_v24, 1 }
 0x100   : > { %v329_v26 = vadd.f32 %v328_v25, %v327_v24 }
 0x102   : > { %437 = vpush %v329_v26 }
 0x133   : > { %s438_s24 = spop %437 }
 0x134   : > { %v331_v27 = vstv %s438_s24 }
 0x135   : > { %332 = vst [vmem:[%s210_s23] sm:$0xff] %v331_v27 }
 0x136 PF: > { %s12_s11 = sadd.s32 1, %s498_s11   ;;  %s568_s9 = smov %s494_s10 }
 0x137   : > { %p9_p5 = scmp.ge.s32.totalorder %s12_s11, 4   ;;  %s569_s10 = smov %s571_s12 }
 0x139   :  { %11 = sbr.rel (!%p9_p5) target bundleno = 2 (0x2), region = 61 }

</bundles_post_ra>
